<compile_context>
chip_gen: v7x
topology: tpu7x:2x2x1
jax: 0.10.0
libtpu: 0.0.40
codegen_flags: <defaults>
</compile_context>

<pallas_src>
import functools

import jax
import jax.numpy as jnp
from jax.experimental import pallas as pl
from jax.experimental.pallas import tpu as pltpu


def _round_up(x, m):
    return ((x + m - 1) // m) * m


def _cdiv(a, b):
    return (a + b - 1) // b


def _mlp_1x1_kernel(x_ref, w1_ref, b1_ref, w2_ref, b2_ref, o_ref, *,
                    bt, c_in, c_hid, c_out):
    """Fused 1x1-conv MLP on one (bt*C_in, TS) tile; spatial axis lane-dense.

    For each of the `bt` images packed into the tile's sublanes:
        h_b = relu(w1 @ x_b + b1)   -> (C_hid, TS)
        y_b = w2 @ h_b + b2         -> (C_out, TS)
    Channel contractions are unrolled VPU rank-1 broadcast-FMAs (no MXU).
    Accumulation is f32; input rows are widened one (1, TS) row at a time so
    bf16 tiles never get an eager full-tile f32 copy.
    """
    w1 = w1_ref[...]      # (C_hid, C_in)  f32
    b1 = b1_ref[...]      # (C_hid, 1)     f32
    w2 = w2_ref[...]      # (C_out, C_hid) f32
    b2 = b2_ref[...]      # (C_out, 1)     f32

    out_blocks = []
    for b in range(bt):
        base = b * c_in

        # Layer 1: h = relu(w1 @ x_b + b1), as C_in rank-1 broadcast-FMAs.
        row = x_ref[pl.ds(base, 1), :].astype(jnp.float32)          # (1, TS)
        h = w1[:, 0:1] * row                                        # (C_hid, TS)
        for ci in range(1, c_in):
            row = x_ref[pl.ds(base + ci, 1), :].astype(jnp.float32)
            h = h + w1[:, ci:ci + 1] * row
        h = jnp.maximum(h + b1, 0.0)

        # Layer 2: y = w2 @ h + b2, as C_hid rank-1 broadcast-FMAs.
        y = w2[:, 0:1] * h[0:1, :]                                  # (C_out, TS)
        for ch in range(1, c_hid):
            y = y + w2[:, ch:ch + 1] * h[ch:ch + 1, :]
        y = y + b2
        out_blocks.append(y.astype(o_ref.dtype))

    # Single lane-dense, full-tile store (TS is the lane axis).
    o_ref[...] = out_blocks[0] if bt == 1 else jnp.concatenate(out_blocks, axis=0)


def _pick_batch_tile(n, c_in, c_out, itemsize):
    """Pack several images' channels into one sublane-dense row block.

    The row extent of both the input block (bt*C_in) and the output block
    (bt*C_out) must either be a multiple of the sublane packing (8 for f32,
    16 for bf16) or cover the full row extent of the array.
    """
    sublanes = max(8, (8 * 4) // max(1, itemsize))   # 8 f32, 16 bf16, 32 int8
    bt = max(1, sublanes // max(c_in, c_out))
    bt = min(bt, n)

    def legal(b):
        return (((b * c_in) % sublanes == 0) or b == n) and \
               (((b * c_out) % sublanes == 0) or b == n)

    while bt > 1 and not legal(bt):
        bt -= 1
    if not legal(bt):
        bt = n          # full-extent row block is always layout-legal
    return bt


@functools.partial(jax.jit, static_argnames=("ts_max",))
def _inner_module_forward(x_nchw, w1, b1, w2, b2, *, ts_max=32768):
    """Pallas forward of the synthetic inner module.  x_nchw: [N, C, H, W].

    Weights are in PyTorch-conv layout: w1 (C_hid, C_in), w2 (C_out, C_hid),
    biases 1-D.
    """
    n, c_in, h, w = x_nchw.shape
    c_hid = w1.shape[0]
    c_out = w2.shape[0]
    s = h * w

    # NCHW -> (N*C, S): contiguous reshape, no transpose; spatial axis lands on
    # the TPU lane axis -> lane-dense loads AND stores.
    x2d = x_nchw.reshape(n * c_in, s)

    # Tiny weights as full-extent f32 VMEM blocks; biases as lane-broadcastable
    # column vectors.  f32 keeps accumulation exact and is v5e-safe (no bf16 VPU).
    w1f = w1.astype(jnp.float32)
    b1f = b1.astype(jnp.float32).reshape(c_hid, 1)
    w2f = w2.astype(jnp.float32)
    b2f = b2.astype(jnp.float32).reshape(c_out, 1)

    # Sublane packing: several images per row block.
    bt = _pick_batch_tile(n, c_in, c_out, jnp.dtype(x_nchw.dtype).itemsize)
    nb = _cdiv(n, bt)

    # Spatial tile: always lane-aligned (multiple of 128), as large as the cap
    # allows; ragged tails handled by the cdiv grid + masked edge writes.
    ts = min(ts_max, _round_up(s, 128))
    # v7x has two TensorCores sharded over the "parallel" grid axes: make sure
    # there are >= 2 grid steps whenever the problem allows it.
    if nb * _cdiv(s, ts) < 2 and s > 128:
        ts = _round_up(_cdiv(s, 2), 128)
    ns = _cdiv(s, ts)

    kernel = functools.partial(_mlp_1x1_kernel, bt=bt, c_in=c_in,
                               c_hid=c_hid, c_out=c_out)

    out2d = pl.pallas_call(
        kernel,
        out_shape=jax.ShapeDtypeStruct((n * c_out, s), x2d.dtype),
        grid_spec=pltpu.PrefetchScalarGridSpec(
            num_scalar_prefetch=0,
            grid=(nb, ns),
            in_specs=[
                pl.BlockSpec((bt * c_in, ts), lambda bi, si: (bi, si)),   # x tile
                pl.BlockSpec((c_hid, c_in), lambda bi, si: (0, 0)),       # w1 (full)
                pl.BlockSpec((c_hid, 1), lambda bi, si: (0, 0)),          # b1 (full)
                pl.BlockSpec((c_out, c_hid), lambda bi, si: (0, 0)),      # w2 (full)
                pl.BlockSpec((c_out, 1), lambda bi, si: (0, 0)),          # b2 (full)
            ],
            out_specs=pl.BlockSpec((bt * c_out, ts), lambda bi, si: (bi, si)),
        ),
        compiler_params=pltpu.CompilerParams(
            dimension_semantics=("parallel", "parallel"),
            # Max tiles are ~1 MiB (in) + ~1 MiB (out), double-buffered ~4 MiB
            # plus in-kernel temporaries — comfortably inside 32 MiB on every
            # generation (v7x physical = 64 MiB), but set explicitly so v5e's
            # 16 MiB default scoped VMEM never limits pipelining.
            vmem_limit_bytes=32 * 1024 * 1024),
    )(x2d, w1f, b1f, w2f, b2f)

    # (N*C_out, S) -> NCHW: contiguous reshape, free.
    return out2d.reshape(n, c_out, h, w)


class BaseModelPallas:
    """JAX equivalent of modeling/BaseModel.py: wraps a module and forwards to it."""

    def __init__(self, opt, module_fn, params):
        self.opt = opt
        self._module_fn = module_fn
        self._params = params

    def __call__(self, *inputs, **kwargs):
        # forward(*inputs, **kwargs) -> self.model(*inputs, **kwargs)
        return self._module_fn(*inputs, *self._params, **kwargs)

    # TODO(synk): save_pretrained / from_pretrained / align_and_update_state_dicts
    # are checkpoint file I/O + state-dict key matching; no device compute, no
    # Pallas equivalent.


def _init_params(key, c_in, c_hid):
    """Conv1x1 params in PyTorch layout: weight (C_out, C_in), bias (C_out,)."""
    k1, k2, k3, k4 = jax.random.split(key, 4)
    w1 = jax.random.normal(k1, (c_hid, c_in), jnp.float32) * 0.1
    b1 = jax.random.normal(k2, (c_hid,), jnp.float32) * 0.1
    w2 = jax.random.normal(k3, (c_in, c_hid), jnp.float32) * 0.1
    b2 = jax.random.normal(k4, (c_in,), jnp.float32) * 0.1
    return w1, b1, w2, b2


if __name__ == "__main__":
    key = jax.random.PRNGKey(0)
    kx, kp = jax.random.split(key)

    N, C, H, W = 2, 4, 16, 16          # small NCHW input
    C_HID = 8

    x = jax.random.normal(kx, (N, C, H, W), jnp.float32)
    params = _init_params(kp, C, C_HID)

    model = BaseModelPallas(opt={"device": "tpu"},
                            module_fn=_inner_module_forward,
                            params=params)

    out = model(x)
    jax.block_until_ready(out)

    # Reference check in plain JAX (same math: per-batch channel matmul).
    w1, b1, w2, b2 = params
    x3d = x.reshape(N, C, H * W)
    h_ref = jnp.maximum(
        jnp.einsum("oc,ncs->nos", w1, x3d) + b1[None, :, None], 0.0)
    y_ref = jnp.einsum("oc,ncs->nos", w2, h_ref) + b2[None, :, None]
    ref = y_ref.reshape(N, C, H, W)

    assert out.shape == (N, C, H, W)
    assert jnp.allclose(out, ref, atol=1e-5, rtol=1e-5)

    print("KERNEL_OK")
</pallas_src>

<mosaic_0001>
module attributes {stable_mosaic.version = 11 : i64} {
  func.func @_mlp_1x1_kernel(%arg0: i32, %arg1: i32, %arg2: memref<8x128xf32, #tpu.memory_space<vmem>>, %arg3: memref<8x4xf32, #tpu.memory_space<vmem>>, %arg4: memref<8x1xf32, #tpu.memory_space<vmem>>, %arg5: memref<4x8xf32, #tpu.memory_space<vmem>>, %arg6: memref<4x1xf32, #tpu.memory_space<vmem>>, %arg7: memref<8x128xf32, #tpu.memory_space<vmem>>) attributes {dimension_semantics = [#tpu.dimension_semantics<parallel>, #tpu.dimension_semantics<parallel>], iteration_bounds = array<i64: 1, 2>, scalar_prefetch = 0 : i64, scratch_operands = 0 : i64, tpu.core_type = #tpu.core_type<tc>, window_params = [{transform_indices = @transform_0, window_bounds = array<i64: 8, 128>}, {pipeline_mode = #tpu.pipeline_mode<synchronous>, transform_indices = @transform_1, window_bounds = array<i64: 8, 4>}, {pipeline_mode = #tpu.pipeline_mode<synchronous>, transform_indices = @transform_2, window_bounds = array<i64: 8, 1>}, {pipeline_mode = #tpu.pipeline_mode<synchronous>, transform_indices = @transform_3, window_bounds = array<i64: 4, 8>}, {pipeline_mode = #tpu.pipeline_mode<synchronous>, transform_indices = @transform_4, window_bounds = array<i64: 4, 1>}, {transform_indices = @transform_5, window_bounds = array<i64: 8, 128>}]} {
    %c0 = arith.constant 0 : index
    %c0_0 = arith.constant 0 : index
    %0 = vector.load %arg3[%c0, %c0_0] : memref<8x4xf32, #tpu.memory_space<vmem>>, vector<8x4xf32>
    %c0_1 = arith.constant 0 : index
    %c0_2 = arith.constant 0 : index
    %1 = vector.load %arg4[%c0_1, %c0_2] : memref<8x1xf32, #tpu.memory_space<vmem>>, vector<8x1xf32>
    %c0_3 = arith.constant 0 : index
    %c0_4 = arith.constant 0 : index
    %2 = vector.load %arg5[%c0_3, %c0_4] : memref<4x8xf32, #tpu.memory_space<vmem>>, vector<4x8xf32>
    %c0_5 = arith.constant 0 : index
    %c0_6 = arith.constant 0 : index
    %3 = vector.load %arg6[%c0_5, %c0_6] : memref<4x1xf32, #tpu.memory_space<vmem>>, vector<4x1xf32>
    %c0_7 = arith.constant 0 : index
    %c0_8 = arith.constant 0 : index
    %4 = vector.load %arg2[%c0_7, %c0_8] : memref<8x128xf32, #tpu.memory_space<vmem>>, vector<1x128xf32>
    %5 = vector.extract_strided_slice %0 {offsets = [0, 0], sizes = [8, 1], strides = [1, 1]} : vector<8x4xf32> to vector<8x1xf32>
    %6 = vector.broadcast %5 : vector<8x1xf32> to vector<8x128xf32>
    %7 = vector.broadcast %4 : vector<1x128xf32> to vector<8x128xf32>
    %8 = arith.mulf %6, %7 : vector<8x128xf32>
    %c1 = arith.constant 1 : index
    %c0_9 = arith.constant 0 : index
    %9 = vector.load %arg2[%c1, %c0_9] : memref<8x128xf32, #tpu.memory_space<vmem>>, vector<1x128xf32>
    %10 = vector.extract_strided_slice %0 {offsets = [0, 1], sizes = [8, 1], strides = [1, 1]} : vector<8x4xf32> to vector<8x1xf32>
    %11 = vector.broadcast %10 : vector<8x1xf32> to vector<8x128xf32>
    %12 = vector.broadcast %9 : vector<1x128xf32> to vector<8x128xf32>
    %13 = arith.mulf %11, %12 : vector<8x128xf32>
    %14 = arith.addf %8, %13 : vector<8x128xf32>
    %c2 = arith.constant 2 : index
    %c0_10 = arith.constant 0 : index
    %15 = vector.load %arg2[%c2, %c0_10] : memref<8x128xf32, #tpu.memory_space<vmem>>, vector<1x128xf32>
    %16 = vector.extract_strided_slice %0 {offsets = [0, 2], sizes = [8, 1], strides = [1, 1]} : vector<8x4xf32> to vector<8x1xf32>
    %17 = vector.broadcast %16 : vector<8x1xf32> to vector<8x128xf32>
    %18 = vector.broadcast %15 : vector<1x128xf32> to vector<8x128xf32>
    %19 = arith.mulf %17, %18 : vector<8x128xf32>
    %20 = arith.addf %14, %19 : vector<8x128xf32>
    %c3 = arith.constant 3 : index
    %c0_11 = arith.constant 0 : index
    %21 = vector.load %arg2[%c3, %c0_11] : memref<8x128xf32, #tpu.memory_space<vmem>>, vector<1x128xf32>
    %22 = vector.extract_strided_slice %0 {offsets = [0, 3], sizes = [8, 1], strides = [1, 1]} : vector<8x4xf32> to vector<8x1xf32>
    %23 = vector.broadcast %22 : vector<8x1xf32> to vector<8x128xf32>
    %24 = vector.broadcast %21 : vector<1x128xf32> to vector<8x128xf32>
    %25 = arith.mulf %23, %24 : vector<8x128xf32>
    %26 = arith.addf %20, %25 : vector<8x128xf32>
    %27 = vector.broadcast %1 : vector<8x1xf32> to vector<8x128xf32>
    %28 = arith.addf %26, %27 : vector<8x128xf32>
    %cst = arith.constant 0.000000e+00 : f32
    %29 = vector.broadcast %cst : f32 to vector<8x128xf32>
    %30 = arith.maximumf %28, %29 : vector<8x128xf32>
    %31 = vector.extract_strided_slice %2 {offsets = [0, 0], sizes = [4, 1], strides = [1, 1]} : vector<4x8xf32> to vector<4x1xf32>
    %32 = vector.extract_strided_slice %30 {offsets = [0, 0], sizes = [1, 128], strides = [1, 1]} : vector<8x128xf32> to vector<1x128xf32>
    %33 = vector.broadcast %31 : vector<4x1xf32> to vector<4x128xf32>
    %34 = vector.broadcast %32 : vector<1x128xf32> to vector<4x128xf32>
    %35 = arith.mulf %33, %34 : vector<4x128xf32>
    %36 = vector.extract_strided_slice %2 {offsets = [0, 1], sizes = [4, 1], strides = [1, 1]} : vector<4x8xf32> to vector<4x1xf32>
    %37 = vector.extract_strided_slice %30 {offsets = [1, 0], sizes = [1, 128], strides = [1, 1]} : vector<8x128xf32> to vector<1x128xf32>
    %38 = vector.broadcast %36 : vector<4x1xf32> to vector<4x128xf32>
    %39 = vector.broadcast %37 : vector<1x128xf32> to vector<4x128xf32>
    %40 = arith.mulf %38, %39 : vector<4x128xf32>
    %41 = arith.addf %35, %40 : vector<4x128xf32>
    %42 = vector.extract_strided_slice %2 {offsets = [0, 2], sizes = [4, 1], strides = [1, 1]} : vector<4x8xf32> to vector<4x1xf32>
    %43 = vector.extract_strided_slice %30 {offsets = [2, 0], sizes = [1, 128], strides = [1, 1]} : vector<8x128xf32> to vector<1x128xf32>
    %44 = vector.broadcast %42 : vector<4x1xf32> to vector<4x128xf32>
    %45 = vector.broadcast %43 : vector<1x128xf32> to vector<4x128xf32>
    %46 = arith.mulf %44, %45 : vector<4x128xf32>
    %47 = arith.addf %41, %46 : vector<4x128xf32>
    %48 = vector.extract_strided_slice %2 {offsets = [0, 3], sizes = [4, 1], strides = [1, 1]} : vector<4x8xf32> to vector<4x1xf32>
    %49 = vector.extract_strided_slice %30 {offsets = [3, 0], sizes = [1, 128], strides = [1, 1]} : vector<8x128xf32> to vector<1x128xf32>
    %50 = vector.broadcast %48 : vector<4x1xf32> to vector<4x128xf32>
    %51 = vector.broadcast %49 : vector<1x128xf32> to vector<4x128xf32>
    %52 = arith.mulf %50, %51 : vector<4x128xf32>
    %53 = arith.addf %47, %52 : vector<4x128xf32>
    %54 = vector.extract_strided_slice %2 {offsets = [0, 4], sizes = [4, 1], strides = [1, 1]} : vector<4x8xf32> to vector<4x1xf32>
    %55 = vector.extract_strided_slice %30 {offsets = [4, 0], sizes = [1, 128], strides = [1, 1]} : vector<8x128xf32> to vector<1x128xf32>
    %56 = vector.broadcast %54 : vector<4x1xf32> to vector<4x128xf32>
    %57 = vector.broadcast %55 : vector<1x128xf32> to vector<4x128xf32>
    %58 = arith.mulf %56, %57 : vector<4x128xf32>
    %59 = arith.addf %53, %58 : vector<4x128xf32>
    %60 = vector.extract_strided_slice %2 {offsets = [0, 5], sizes = [4, 1], strides = [1, 1]} : vector<4x8xf32> to vector<4x1xf32>
    %61 = vector.extract_strided_slice %30 {offsets = [5, 0], sizes = [1, 128], strides = [1, 1]} : vector<8x128xf32> to vector<1x128xf32>
    %62 = vector.broadcast %60 : vector<4x1xf32> to vector<4x128xf32>
    %63 = vector.broadcast %61 : vector<1x128xf32> to vector<4x128xf32>
    %64 = arith.mulf %62, %63 : vector<4x128xf32>
    %65 = arith.addf %59, %64 : vector<4x128xf32>
    %66 = vector.extract_strided_slice %2 {offsets = [0, 6], sizes = [4, 1], strides = [1, 1]} : vector<4x8xf32> to vector<4x1xf32>
    %67 = vector.extract_strided_slice %30 {offsets = [6, 0], sizes = [1, 128], strides = [1, 1]} : vector<8x128xf32> to vector<1x128xf32>
    %68 = vector.broadcast %66 : vector<4x1xf32> to vector<4x128xf32>
    %69 = vector.broadcast %67 : vector<1x128xf32> to vector<4x128xf32>
    %70 = arith.mulf %68, %69 : vector<4x128xf32>
    %71 = arith.addf %65, %70 : vector<4x128xf32>
    %72 = vector.extract_strided_slice %2 {offsets = [0, 7], sizes = [4, 1], strides = [1, 1]} : vector<4x8xf32> to vector<4x1xf32>
    %73 = vector.extract_strided_slice %30 {offsets = [7, 0], sizes = [1, 128], strides = [1, 1]} : vector<8x128xf32> to vector<1x128xf32>
    %74 = vector.broadcast %72 : vector<4x1xf32> to vector<4x128xf32>
    %75 = vector.broadcast %73 : vector<1x128xf32> to vector<4x128xf32>
    %76 = arith.mulf %74, %75 : vector<4x128xf32>
    %77 = arith.addf %71, %76 : vector<4x128xf32>
    %78 = vector.broadcast %3 : vector<4x1xf32> to vector<4x128xf32>
    %79 = arith.addf %77, %78 : vector<4x128xf32>
    %c4 = arith.constant 4 : index
    %c0_12 = arith.constant 0 : index
    %80 = vector.load %arg2[%c4, %c0_12] : memref<8x128xf32, #tpu.memory_space<vmem>>, vector<1x128xf32>
    %81 = vector.extract_strided_slice %0 {offsets = [0, 0], sizes = [8, 1], strides = [1, 1]} : vector<8x4xf32> to vector<8x1xf32>
    %82 = vector.broadcast %81 : vector<8x1xf32> to vector<8x128xf32>
    %83 = vector.broadcast %80 : vector<1x128xf32> to vector<8x128xf32>
    %84 = arith.mulf %82, %83 : vector<8x128xf32>
    %c5 = arith.constant 5 : index
    %c0_13 = arith.constant 0 : index
    %85 = vector.load %arg2[%c5, %c0_13] : memref<8x128xf32, #tpu.memory_space<vmem>>, vector<1x128xf32>
    %86 = vector.extract_strided_slice %0 {offsets = [0, 1], sizes = [8, 1], strides = [1, 1]} : vector<8x4xf32> to vector<8x1xf32>
    %87 = vector.broadcast %86 : vector<8x1xf32> to vector<8x128xf32>
    %88 = vector.broadcast %85 : vector<1x128xf32> to vector<8x128xf32>
    %89 = arith.mulf %87, %88 : vector<8x128xf32>
    %90 = arith.addf %84, %89 : vector<8x128xf32>
    %c6 = arith.constant 6 : index
    %c0_14 = arith.constant 0 : index
    %91 = vector.load %arg2[%c6, %c0_14] : memref<8x128xf32, #tpu.memory_space<vmem>>, vector<1x128xf32>
    %92 = vector.extract_strided_slice %0 {offsets = [0, 2], sizes = [8, 1], strides = [1, 1]} : vector<8x4xf32> to vector<8x1xf32>
    %93 = vector.broadcast %92 : vector<8x1xf32> to vector<8x128xf32>
    %94 = vector.broadcast %91 : vector<1x128xf32> to vector<8x128xf32>
    %95 = arith.mulf %93, %94 : vector<8x128xf32>
    %96 = arith.addf %90, %95 : vector<8x128xf32>
    %c7 = arith.constant 7 : index
    %c0_15 = arith.constant 0 : index
    %97 = vector.load %arg2[%c7, %c0_15] : memref<8x128xf32, #tpu.memory_space<vmem>>, vector<1x128xf32>
    %98 = vector.extract_strided_slice %0 {offsets = [0, 3], sizes = [8, 1], strides = [1, 1]} : vector<8x4xf32> to vector<8x1xf32>
    %99 = vector.broadcast %98 : vector<8x1xf32> to vector<8x128xf32>
    %100 = vector.broadcast %97 : vector<1x128xf32> to vector<8x128xf32>
    %101 = arith.mulf %99, %100 : vector<8x128xf32>
    %102 = arith.addf %96, %101 : vector<8x128xf32>
    %103 = vector.broadcast %1 : vector<8x1xf32> to vector<8x128xf32>
    %104 = arith.addf %102, %103 : vector<8x128xf32>
    %cst_16 = arith.constant 0.000000e+00 : f32
    %105 = vector.broadcast %cst_16 : f32 to vector<8x128xf32>
    %106 = arith.maximumf %104, %105 : vector<8x128xf32>
    %107 = vector.extract_strided_slice %2 {offsets = [0, 0], sizes = [4, 1], strides = [1, 1]} : vector<4x8xf32> to vector<4x1xf32>
    %108 = vector.extract_strided_slice %106 {offsets = [0, 0], sizes = [1, 128], strides = [1, 1]} : vector<8x128xf32> to vector<1x128xf32>
    %109 = vector.broadcast %107 : vector<4x1xf32> to vector<4x128xf32>
    %110 = vector.broadcast %108 : vector<1x128xf32> to vector<4x128xf32>
    %111 = arith.mulf %109, %110 : vector<4x128xf32>
    %112 = vector.extract_strided_slice %2 {offsets = [0, 1], sizes = [4, 1], strides = [1, 1]} : vector<4x8xf32> to vector<4x1xf32>
    %113 = vector.extract_strided_slice %106 {offsets = [1, 0], sizes = [1, 128], strides = [1, 1]} : vector<8x128xf32> to vector<1x128xf32>
    %114 = vector.broadcast %112 : vector<4x1xf32> to vector<4x128xf32>
    %115 = vector.broadcast %113 : vector<1x128xf32> to vector<4x128xf32>
    %116 = arith.mulf %114, %115 : vector<4x128xf32>
    %117 = arith.addf %111, %116 : vector<4x128xf32>
    %118 = vector.extract_strided_slice %2 {offsets = [0, 2], sizes = [4, 1], strides = [1, 1]} : vector<4x8xf32> to vector<4x1xf32>
    %119 = vector.extract_strided_slice %106 {offsets = [2, 0], sizes = [1, 128], strides = [1, 1]} : vector<8x128xf32> to vector<1x128xf32>
    %120 = vector.broadcast %118 : vector<4x1xf32> to vector<4x128xf32>
    %121 = vector.broadcast %119 : vector<1x128xf32> to vector<4x128xf32>
    %122 = arith.mulf %120, %121 : vector<4x128xf32>
    %123 = arith.addf %117, %122 : vector<4x128xf32>
    %124 = vector.extract_strided_slice %2 {offsets = [0, 3], sizes = [4, 1], strides = [1, 1]} : vector<4x8xf32> to vector<4x1xf32>
    %125 = vector.extract_strided_slice %106 {offsets = [3, 0], sizes = [1, 128], strides = [1, 1]} : vector<8x128xf32> to vector<1x128xf32>
    %126 = vector.broadcast %124 : vector<4x1xf32> to vector<4x128xf32>
    %127 = vector.broadcast %125 : vector<1x128xf32> to vector<4x128xf32>
    %128 = arith.mulf %126, %127 : vector<4x128xf32>
    %129 = arith.addf %123, %128 : vector<4x128xf32>
    %130 = vector.extract_strided_slice %2 {offsets = [0, 4], sizes = [4, 1], strides = [1, 1]} : vector<4x8xf32> to vector<4x1xf32>
    %131 = vector.extract_strided_slice %106 {offsets = [4, 0], sizes = [1, 128], strides = [1, 1]} : vector<8x128xf32> to vector<1x128xf32>
    %132 = vector.broadcast %130 : vector<4x1xf32> to vector<4x128xf32>
    %133 = vector.broadcast %131 : vector<1x128xf32> to vector<4x128xf32>
    %134 = arith.mulf %132, %133 : vector<4x128xf32>
    %135 = arith.addf %129, %134 : vector<4x128xf32>
    %136 = vector.extract_strided_slice %2 {offsets = [0, 5], sizes = [4, 1], strides = [1, 1]} : vector<4x8xf32> to vector<4x1xf32>
    %137 = vector.extract_strided_slice %106 {offsets = [5, 0], sizes = [1, 128], strides = [1, 1]} : vector<8x128xf32> to vector<1x128xf32>
    %138 = vector.broadcast %136 : vector<4x1xf32> to vector<4x128xf32>
    %139 = vector.broadcast %137 : vector<1x128xf32> to vector<4x128xf32>
    %140 = arith.mulf %138, %139 : vector<4x128xf32>
    %141 = arith.addf %135, %140 : vector<4x128xf32>
    %142 = vector.extract_strided_slice %2 {offsets = [0, 6], sizes = [4, 1], strides = [1, 1]} : vector<4x8xf32> to vector<4x1xf32>
    %143 = vector.extract_strided_slice %106 {offsets = [6, 0], sizes = [1, 128], strides = [1, 1]} : vector<8x128xf32> to vector<1x128xf32>
    %144 = vector.broadcast %142 : vector<4x1xf32> to vector<4x128xf32>
    %145 = vector.broadcast %143 : vector<1x128xf32> to vector<4x128xf32>
    %146 = arith.mulf %144, %145 : vector<4x128xf32>
    %147 = arith.addf %141, %146 : vector<4x128xf32>
    %148 = vector.extract_strided_slice %2 {offsets = [0, 7], sizes = [4, 1], strides = [1, 1]} : vector<4x8xf32> to vector<4x1xf32>
    %149 = vector.extract_strided_slice %106 {offsets = [7, 0], sizes = [1, 128], strides = [1, 1]} : vector<8x128xf32> to vector<1x128xf32>
    %150 = vector.broadcast %148 : vector<4x1xf32> to vector<4x128xf32>
    %151 = vector.broadcast %149 : vector<1x128xf32> to vector<4x128xf32>
    %152 = arith.mulf %150, %151 : vector<4x128xf32>
    %153 = arith.addf %147, %152 : vector<4x128xf32>
    %154 = vector.broadcast %3 : vector<4x1xf32> to vector<4x128xf32>
    %155 = arith.addf %153, %154 : vector<4x128xf32>
    %156 = tpu.concatenate %79, %155 in 0 : vector<4x128xf32>, vector<4x128xf32> -> vector<8x128xf32>
    %c0_17 = arith.constant 0 : index
    %c0_18 = arith.constant 0 : index
    %157 = vector.load %arg7[%c0_17, %c0_18] : memref<8x128xf32, #tpu.memory_space<vmem>>, vector<8x128xf32>
    tpu.vector_store %arg7[%c0_17, %c0_18], %156 {strides = array<i32>} : memref<8x128xf32, #tpu.memory_space<vmem>>, vector<8x128xf32>,
    return
  }
  func.func @transform_0(%arg0: i32, %arg1: i32) -> (i32, i32) {
    %c0_i32 = arith.constant 0 : i32
    return %arg0, %arg1 : i32, i32
  }
  func.func @transform_1(%arg0: i32, %arg1: i32) -> (i32, i32) {
    %c0_i32 = arith.constant 0 : i32
    %c0_i32_0 = arith.constant 0 : i32
    %c0_i32_1 = arith.constant 0 : i32
    return %c0_i32, %c0_i32_0 : i32, i32
  }
  func.func @transform_2(%arg0: i32, %arg1: i32) -> (i32, i32) {
    %c0_i32 = arith.constant 0 : i32
    %c0_i32_0 = arith.constant 0 : i32
    %c0_i32_1 = arith.constant 0 : i32
    return %c0_i32, %c0_i32_0 : i32, i32
  }
  func.func @transform_3(%arg0: i32, %arg1: i32) -> (i32, i32) {
    %c0_i32 = arith.constant 0 : i32
    %c0_i32_0 = arith.constant 0 : i32
    %c0_i32_1 = arith.constant 0 : i32
    return %c0_i32, %c0_i32_0 : i32, i32
  }
  func.func @transform_4(%arg0: i32, %arg1: i32) -> (i32, i32) {
    %c0_i32 = arith.constant 0 : i32
    %c0_i32_0 = arith.constant 0 : i32
    %c0_i32_1 = arith.constant 0 : i32
    return %c0_i32, %c0_i32_0 : i32, i32
  }
  func.func @transform_5(%arg0: i32, %arg1: i32) -> (i32, i32) {
    %c0_i32 = arith.constant 0 : i32
    return %arg0, %arg1 : i32, i32
  }
}

</mosaic_0001>

<bundles_post_ra>
// kernel: _inner_module_forward.1
= control target key start
LH: loop header
LB: loop body
LE: loop exit
PB: predicated region body
PF: predicated region fallthrough
CT: control target
= control target key end

     0   :  { %s689_s18 = smov 0   ;;  %s691_s19 = smov 0   ;;  %s755_s0 = inlined_call_operand.vmem [shape: f32[8,256], index: 0, kind: input, shape index: {}]   ;;  %s756_s1 = inlined_call_operand.vmem [shape: f32[8,4], index: 1, kind: input, shape index: {}]   ;;  %s757_s2 = inlined_call_operand.vmem [shape: f32[8,1], index: 2, kind: input, shape index: {}]   ;;  %s758_s3 = inlined_call_operand.vmem [shape: f32[4,8], index: 3, kind: input, shape index: {}]   ;;  %s759_s4 = inlined_call_operand.vmem [shape: f32[4,1], index: 4, kind: input, shape index: {}]   ;;  %s760_s5 = inlined_call_operand.vmem [shape: f32[8,256], index: 5, kind: output, shape index: {}]  }
   0x1   :  { %s693_s20 = smov 0  }
   0x2 LB: > { %s24_s21 = sadd.s32 1, %s645_s19  ;;  %p567_p0 = scmp.ge.s32.totalorder %s649_s20, 1  ;;  %s649_s20 = sphi %s693_s20, %s15_s20   ;;  %s645_s19 = sphi %s691_s19, %s762_s19   ;;  %s641_s18 = sphi %s689_s18, %s761_s18  }
   0x3   : > { %p25_p1 = scmp.ge.s32.totalorder %s24_s21, 2  ;;  %p206_p2 = scmp.lt.s32.totalorder %s649_s20, 3 }
   0x5   : > { %s764_s21 = smov (%p25_p1, %s24_s21), 0  ;;  %p207_p3 = pnand %p567_p0, %p206_p2 }
   0x6   : > { %v256_v0 = vld [vmem:[%s756_s1] sm:$0xff] (!%p207_p3)  ;;  %v651_v1 = vmov (!%p207_p3), 2   ;;  %v652_v2 = vmov (!%p207_p3), 0   ;;  %v653_v3 = vmov (!%p207_p3), 3   ;;  %v654_v4 = vmov (!%p207_p3), 1   ;;  %p242_p4 = scmp.lt.s32.totalorder (!%p207_p3), %s641_s18, 1 }
   0x7   : > { %210 = sbr.rel (%p207_p3) target bundleno = 182 (0xb6), region = 40  ;;  %614 = vset.pattern.permute.xlu1 (!%p207_p3), %v651_v1  ;;  %612 = vset.pattern.permute.xlu0 (!%p207_p3), %v652_v2  ;;  %v257_v5 = vld [vmem:[%s757_s2] sm:$0xff] (!%p207_p3)  ;;  %v655_v7 = vmov (!%p207_p3), 6   ;;  %v656_v8 = vmov (!%p207_p3), 4   ;;  %v657_v9 = vmov (!%p207_p3), 5   ;;  %v658_v10 = vmov (!%p207_p3), 7  }
   0x8   : > { %284 = vperm.xlu1 (!%p207_p3), %614, %v256_v0   ;;  %263 = vperm.xlu0 (!%p207_p3), %612, %v256_v0   ;;  %v258_v6 = vld [vmem:[%s758_s3] sm:$0xf] (!%p207_p3)  ;;  %v316_v24 = vlaneseq (!%p207_p3)  ;;  %vm477_vm0 = vcmask (!%p207_p3), 1043456  }
   0x9   : > { %v259_v11 = vld [vmem:[%s759_s4] sm:$0xf] (!%p207_p3) }
   0xa   : > { %v731_v33 = vshrl.u32 (!%p207_p3), %v316_v24, 7 }
   0xc   : > { %615 = vset.pattern.permute.xlu1 (!%p207_p3), %v653_v3  ;;  %613 = vset.pattern.permute.xlu0 (!%p207_p3), %v654_v4  ;;  %v318_v43 = vsub.s32 (!%p207_p3), 0, %v731_v33  ;;  %v327_v44 = vsub.s32 (!%p207_p3), 1, %v731_v33  ;;  %v337_v46 = vsub.s32 (!%p207_p3), 2, %v731_v33  ;;  %v347_v49 = vsub.s32 (!%p207_p3), 3, %v731_v33 }
   0xd   : > { %295 = vperm.xlu1 (!%p207_p3), %615, %v256_v0   ;;  %273 = vperm.xlu0 (!%p207_p3), %613, %v256_v0   ;;  %v357_v57 = vsub.s32 (!%p207_p3), 4, %v731_v33 }
   0xe   : > { %s766_s18 = smov (!%p242_p4, %s641_s18), 1 }
   0xf   : > { %s568_s30 = sshll.u32 %s766_s18, 3 }
  0x10   : > { %s247_s8 = scalar_lea.vmem %s755_s0, %s568_s30  ;;  %s255_s11 = scalar_lea.vmem %s760_s5, %s568_s30 }
  0x11   : > { %616 = vset.pattern.permute.xlu1 %v652_v2  ;;  %617 = vset.pattern.permute.xlu0 %v652_v2  ;;  %v570_v14 = vld [vmem:[%s247_s8] ss:$0 sm:$0xff]  ;;  %v574_v15 = vld [vmem:[%s247_s8 + $0x4] ss:$0 sm:$0xff]  ;;  %v571_v16 = vld [vmem:[%s247_s8 + $0x1] ss:$0 sm:$0xff] }
  0x12   : > { %306 = vperm.xlu1 %616, %v257_v5   ;;  %313 = vperm.xlu0 %617, %v258_v6   ;;  %v575_v17 = vld [vmem:[%s247_s8 + $0x5] ss:$0 sm:$0xff]  ;;  %v572_v20 = vld [vmem:[%s247_s8 + $0x2] ss:$0 sm:$0xff]  ;;  %v576_v21 = vld [vmem:[%s247_s8 + $0x6] ss:$0 sm:$0xff] }
  0x13   : > { %v573_v27 = vld [vmem:[%s247_s8 + $0x3] ss:$0 sm:$0xff]  ;;  %v577_v28 = vld [vmem:[%s247_s8 + $0x7] ss:$0 sm:$0xff] }
  0x16   : > { %618 = vset.pattern.permute.xlu1 %v654_v4  ;;  %620 = vset.pattern.permute.xlu0 %v653_v3 }
  0x17   : > { %322 = vperm.xlu1 %618, %v258_v6   ;;  %342 = vperm.xlu0 %620, %v258_v6  }
  0x1b   : > { %619 = vset.pattern.permute.xlu1 %v651_v1  ;;  %623 = vset.pattern.permute.xlu0 %v655_v7 }
  0x1c   : > { %332 = vperm.xlu1 %619, %v258_v6   ;;  %372 = vperm.xlu0 %623, %v258_v6  }
  0x20   : > { %621 = vset.pattern.permute.xlu1 %v656_v8  ;;  %626 = vset.pattern.permute.xlu0 %v652_v2  ;;  %v377_v8 = vsub.s32 6, %v731_v33 }
  0x21   : > { %352 = vperm.xlu1 %621, %v258_v6  }
  0x25   : > { %622 = vset.pattern.permute.xlu1 %v657_v9  ;;  %v367_v9 = vsub.s32 5, %v731_v33 }
  0x26   : > { %362 = vperm.xlu1 %622, %v258_v6  }
  0x2a   : > { %624 = vset.pattern.permute.xlu1 %v658_v10 }
  0x2b   : > { %382 = vperm.xlu1 %624, %v258_v6  }
  0x2f   : > { %625 = vset.pattern.permute.xlu1 %v652_v2 }
  0x30   : > { %393 = vperm.xlu1 %625, %v259_v11  }
  0x87   : > { %v285_v12 = vpop.permute.xlu1 %284  ;;  %v264_v13 = vpop.permute.xlu0 %263 }
  0x88   : > { %v270_v18 = vmul.f32 %v570_v14, %v264_v13  ;;  %v402_v19 = vmul.f32 %v574_v15, %v264_v13  ;;  %v291_v29 = vmul.f32 %v572_v20, %v285_v12  ;;  %v415_v30 = vmul.f32 %v576_v21, %v285_v12 }
  0x8c   : > { %v296_v22 = vpop.permute.xlu1 %295  ;;  %v274_v23 = vpop.permute.xlu0 %273 }
  0x8d   : > { %v280_v25 = vmul.f32 %v571_v16, %v274_v23  ;;  %v408_v26 = vmul.f32 %v575_v17, %v274_v23  ;;  %v302_v34 = vmul.f32 %v573_v27, %v296_v22  ;;  %v422_v35 = vmul.f32 %v577_v28, %v296_v22 }
  0x8f   : > { %v281_v31 = vadd.f32 %v280_v25, %v270_v18  ;;  %v409_v32 = vadd.f32 %v408_v26, %v402_v19  ;;  %v387_v25 = vsub.s32 7, %v731_v33 }
  0x91   : > { %v307_v36 = vpop.permute.xlu1 %306  ;;  %v292_v37 = vadd.f32 %v291_v29, %v281_v31  ;;  %v416_v38 = vadd.f32 %v415_v30, %v409_v32  ;;  %v314_v50 = vpop.permute.xlu0 %313 }
  0x93   : > { %v303_v39 = vadd.f32 %v302_v34, %v292_v37  ;;  %v423_v40 = vadd.f32 %v422_v35, %v416_v38 }
  0x95   : > { %v309_v41 = vadd.f32 %v307_v36, %v303_v39  ;;  %v424_v42 = vadd.f32 %v423_v40, %v307_v36 }
  0x96   : > { %v323_v45 = vpop.permute.xlu1 %322  ;;  %v343_v5 = vpop.permute.xlu0 %342 }
  0x97   : > { %v310_v47 = vmax.f32 %v309_v41, 0.0  ;;  %v425_v48 = vmax.f32 %v424_v42, 0.0 }
  0x99   : > { %v319_v51 = vrot.slane %v310_v47, %v318_v43  ;;  %v429_v52 = vrot.slane %v425_v48, %v318_v43  ;;  %v328_v53 = vrot.slane %v310_v47, %v327_v44  ;;  %v434_v54 = vrot.slane %v425_v48, %v327_v44 }
  0x9a   : > { %v338_v55 = vrot.slane %v310_v47, %v337_v46  ;;  %v440_v56 = vrot.slane %v425_v48, %v337_v46  ;;  %v348_v63 = vrot.slane %v310_v47, %v347_v49  ;;  %v446_v0 = vrot.slane %v425_v48, %v347_v49 }
  0x9b   : > { %v320_v58 = vmul.f32 %v319_v51, %v314_v50  ;;  %v430_v59 = vmul.f32 %v429_v52, %v314_v50  ;;  %v329_v60 = vmul.f32 %v328_v53, %v323_v45  ;;  %v435_v61 = vmul.f32 %v434_v54, %v323_v45  ;;  %v333_v62 = vpop.permute.xlu1 %332  ;;  %v373_v23 = vpop.permute.xlu0 %372 }
  0x9c   : > { %v339_v1 = vmul.f32 %v338_v55, %v333_v62  ;;  %v441_v2 = vmul.f32 %v440_v56, %v333_v62  ;;  %v349_v10 = vmul.f32 %v348_v63, %v343_v5  ;;  %v447_v11 = vmul.f32 %v446_v0, %v343_v5 }
  0x9d   : > { %v330_v3 = vadd.f32 %v329_v60, %v320_v58  ;;  %v436_v4 = vadd.f32 %v435_v61, %v430_v59  ;;  %v358_v13 = vrot.slane %v310_v47, %v357_v57  ;;  %v452_v14 = vrot.slane %v425_v48, %v357_v57 }
  0x9e   : > { %v378_v19 = vrot.slane %v310_v47, %v377_v8  ;;  %v464_v20 = vrot.slane %v425_v48, %v377_v8  ;;  %v368_v21 = vrot.slane %v310_v47, %v367_v9  ;;  %v458_v22 = vrot.slane %v425_v48, %v367_v9 }
  0x9f   : > { %v340_v6 = vadd.f32 %v339_v1, %v330_v3  ;;  %v442_v7 = vadd.f32 %v441_v2, %v436_v4  ;;  %v388_v35 = vrot.slane %v310_v47, %v387_v25  ;;  %v470_v36 = vrot.slane %v425_v48, %v387_v25 }
  0xa0   : > { %v353_v12 = vpop.permute.xlu1 %352  ;;  %v379_v30 = vmul.f32 %v378_v19, %v373_v23  ;;  %v465_v31 = vmul.f32 %v464_v20, %v373_v23 }
  0xa1   : > { %v350_v15 = vadd.f32 %v349_v10, %v340_v6  ;;  %v359_v16 = vmul.f32 %v358_v13, %v353_v12  ;;  %v448_v17 = vadd.f32 %v447_v11, %v442_v7  ;;  %v453_v18 = vmul.f32 %v452_v14, %v353_v12 }
  0xa3   : > { %v360_v26 = vadd.f32 %v359_v16, %v350_v15  ;;  %v454_v27 = vadd.f32 %v453_v18, %v448_v17 }
  0xa5   : > { %v363_v24 = vpop.permute.xlu1 %362 }
  0xa6   : > { %v369_v28 = vmul.f32 %v368_v21, %v363_v24  ;;  %v459_v29 = vmul.f32 %v458_v22, %v363_v24 }
  0xa8   : > { %v370_v32 = vadd.f32 %v369_v28, %v360_v26  ;;  %v460_v34 = vadd.f32 %v459_v29, %v454_v27 }
  0xaa   : > { %v383_v37 = vpop.permute.xlu1 %382  ;;  %v380_v38 = vadd.f32 %v379_v30, %v370_v32  ;;  %v466_v39 = vadd.f32 %v465_v31, %v460_v34 }
  0xab   : > { %v389_v40 = vmul.f32 %v388_v35, %v383_v37  ;;  %v471_v41 = vmul.f32 %v470_v36, %v383_v37 }
  0xad   : > { %v472_v42 = vadd.f32 %v471_v41, %v466_v39  ;;  %v390_v43 = vadd.f32 %v389_v40, %v380_v38 }
  0xaf   : > { %v394_v44 = vpop.permute.xlu1 %393 }
  0xb0   : > { %v473_v33 = vadd.f32 %v472_v42, %v394_v44  ;;  %v396_v45 = vadd.f32 %v394_v44, %v390_v43 }
  0xb2   : > { %v475_v46 = vrot.slane %v473_v33, 4 }
  0xb4   : > { %v478_v49 = vsel %vm477_vm0, %v396_v45, %v475_v46 }
  0xb5   : > { %479 = vst [vmem:[%s255_s11] sm:$0xff] %v478_v49 }
  0xb6 PF: > { %s15_s20 = sadd.s32 1, %s649_s20   ;;  %s761_s18 = smov %s645_s19 }
  0xb7   : > { %p12_p5 = scmp.ge.s32.totalorder %s15_s20, 4   ;;  %s762_s19 = smov %s764_s21 }
  0xb9   :  { %14 = sbr.rel (!%p12_p5) target bundleno = 2 (0x2), region = 70 }

</bundles_post_ra>
